<compile_context>
chip_gen: v6e
topology: v6e:2x2x1
jax: 0.10.0
libtpu: 0.0.40
codegen_flags: <defaults>
</compile_context>

<pallas_src>
import functools

import jax
import jax.numpy as jnp
from jax.experimental import pallas as pl
from jax.experimental.pallas import tpu as pltpu

IN_FEATURES = 28 * 28   # 784
EMB = 100               # inpt Linear output / GRU input size
HID = 10                # GRU hidden size / oupt Linear size
H3 = 3 * HID            # concatenated gate width [r | z | n]

# --- small-slab row layout: every non-dominant weight/bias packed into one 2-D array ---
ROW_WHH = 0                    # rows [0, HID)        : W_hh concat (HID, 3*HID)
ROW_BHH = HID                  # row  HID             : b_hh concat (3*HID,)
ROW_BGI = HID + 1              # row  HID+1           : folded input-proj bias (3*HID,)
ROW_WOUT = HID + 2             # rows [HID+2, 2H+2)   : W_out (HID, HID) in cols [0, HID)
ROW_BOUT = 2 * HID + 2         # row  2*HID+2         : b_out in cols [0, HID)
SMALL_ROWS = 2 * HID + 4       # = 24 (padded to a multiple of 8 sublanes)


# ----------------------------- fused Pallas kernel -----------------------------

def _net_kernel(x_ref, w_comb_ref, small_ref, y_ref, h_n_ref, *, batch, seq):
    BT = batch * seq

    # ---- unpack the packed small-weight slab (static slices, one-time tiny reads) ----
    w_hh = small_ref[ROW_WHH:ROW_WHH + HID, :]            # (HID, 3H)
    b_hh = small_ref[ROW_BHH:ROW_BHH + 1, :]              # (1, 3H)
    b_gi = small_ref[ROW_BGI:ROW_BGI + 1, :]              # (1, 3H)
    w_out = small_ref[ROW_WOUT:ROW_WOUT + HID, 0:HID]     # (HID, HID)
    b_out = small_ref[ROW_BOUT:ROW_BOUT + 1, 0:HID]       # (1, HID)

    # ---- hoisted input-side gate projection for ALL (b, t) rows: one K=784 matmul ----
    # (embedding Linear already folded into w_comb / b_gi offline)
    gi = jnp.dot(x_ref[...], w_comb_ref[...],
                 preferred_element_type=jnp.float32) + b_gi                    # (BT, 3H)
    gi_r = gi[:, 0:HID]
    gi_z = gi[:, HID:2 * HID]
    gi_n = gi[:, 2 * HID:3 * HID]

    # Rows are batch-first flattened: row = b*seq + t;  row_time[i] = t of row i.
    row_time = jax.lax.broadcasted_iota(jnp.int32, (BT, HID), 0) % seq

    # ---- recurrence: T tiny & static -> fully unrolled; all state stays in vregs ----
    h_all = jnp.zeros((BT, HID), jnp.float32)   # row b*seq+t ends up holding h_{b,t}
    for t in range(seq):
        # prev[i] = h_all[i-1]  (sublane roll; XLU slot, no MXU round trip).
        # Wrapped row 0 and every t==0 row only commit at t==0 (h_all still all-zero),
        # so the wraparound / cross-batch reads are masked out by row_time below.
        prev = pltpu.roll(h_all, shift=1, axis=0)
        # one fused hidden-side gate matmul per step (single MXU weight load)
        gh = jnp.dot(prev, w_hh, preferred_element_type=jnp.float32) + b_hh    # (BT, 3H)
        r = jax.nn.sigmoid(gi_r + gh[:, 0:HID])
        z = jax.nn.sigmoid(gi_z + gh[:, HID:2 * HID])
        n = jnp.tanh(gi_n + r * gh[:, 2 * HID:3 * HID])
        h_new = (1.0 - z) * n + z * prev
        h_all = jnp.where(row_time == t, h_new, h_all)

    # ---- epilogue: output Linear + final-hidden extraction, single writeback each ----
    y_ref[...] = jnp.dot(h_all, w_out, preferred_element_type=jnp.float32) + b_out

    # Final hidden = rows b*seq + (seq-1).  A tiny (B, BT) selection matmul keeps the
    # extraction in-kernel (no strided slice in the kernel, no gather op in the wrapper).
    bi = jax.lax.broadcasted_iota(jnp.int32, (batch, BT), 0)
    ci = jax.lax.broadcasted_iota(jnp.int32, (batch, BT), 1)
    sel = jnp.where(ci == bi * seq + (seq - 1), jnp.float32(1.0), jnp.float32(0.0))
    h_n_ref[...] = jnp.dot(sel, h_all, preferred_element_type=jnp.float32)


# ----------------------------- one-time weight preprocessing -----------------------------

def preprocess_params(params):
    """One-time weight re-layout + offline fold of the embedding Linear into the GRU
    input projection.  Call ONCE outside jit; results are reused across forward calls."""
    hi = jax.lax.Precision.HIGHEST
    # PyTorch gate order [r, z, n]; per-gate (in, HID) layout, concatenated along lanes.
    w_ihg = jnp.transpose(params["w_ih"].reshape(3, HID, EMB), (0, 2, 1))      # (3,EMB,HID)
    w_ih_cat = jnp.concatenate([w_ihg[0], w_ihg[1], w_ihg[2]], axis=1)         # (EMB, 3H)
    w_hhg = jnp.transpose(params["w_hh"].reshape(3, HID, HID), (0, 2, 1))      # (3,HID,HID)
    w_hh_cat = jnp.concatenate([w_hhg[0], w_hhg[1], w_hhg[2]], axis=1)         # (HID, 3H)

    # Fold:  (x @ W_in + b_in) @ W_ih_cat + b_ih  ==  x @ W_comb + b_gi
    w_comb = jnp.dot(params["w_in"], w_ih_cat, precision=hi)                   # (784, 3H)
    b_gi = jnp.dot(params["b_in"], w_ih_cat, precision=hi) + params["b_ih"]    # (3H,)

    small = jnp.zeros((SMALL_ROWS, H3), jnp.float32)
    small = small.at[ROW_WHH:ROW_WHH + HID, :].set(w_hh_cat)
    small = small.at[ROW_BHH, :].set(params["b_hh"])
    small = small.at[ROW_BGI, :].set(b_gi)
    small = small.at[ROW_WOUT:ROW_WOUT + HID, 0:HID].set(params["w_out"])
    small = small.at[ROW_BOUT, 0:HID].set(params["b_out"])
    return {"w_comb": w_comb, "small": small}


# ----------------------------- Net forward (wrapper) -----------------------------

def net_forward(kparams, x):
    """Equivalent of Net.forward: returns (oupt(GRU outputs), final hidden)."""
    B, T, F = x.shape
    BT = B * T
    x_flat = x.reshape(BT, F)          # free reshape; row = b*T + t (batch-first)

    kernel = functools.partial(_net_kernel, batch=B, seq=T)
    y_flat, h_n = pl.pallas_call(
        kernel,
        out_shape=(
            jax.ShapeDtypeStruct((BT, HID), jnp.float32),   # oupt(rnn_out), flat
            jax.ShapeDtypeStruct((B, HID), jnp.float32),    # final hidden h_{b, T-1}
        ),
        grid=(1,),
        in_specs=[
            pl.BlockSpec((BT, F), lambda i: (0, 0)),
            pl.BlockSpec((F, H3), lambda i: (0, 0)),
            pl.BlockSpec((SMALL_ROWS, H3), lambda i: (0, 0)),
        ],
        out_specs=(
            pl.BlockSpec((BT, HID), lambda i: (0, 0)),
            pl.BlockSpec((B, HID), lambda i: (0, 0)),
        ),
        compiler_params=pltpu.CompilerParams(dimension_semantics=("arbitrary",)),
    )(x_flat, kparams["w_comb"], kparams["small"])

    # Only free reshapes in the wrapper (no gathers / transposes of activations).
    return y_flat.reshape(B, T, HID), h_n[None]     # (B,T,HID), (1,B,HID) PyTorch layout


# ----------------------------- pure-JAX reference -----------------------------

def reference(params, x):
    B, T, F = x.shape
    hi = jax.lax.Precision.HIGHEST
    emb = jnp.dot(x.reshape(B * T, F), params["w_in"], precision=hi) + params["b_in"]
    emb = emb.reshape(B, T, EMB)
    wih_t, whh_t = params["w_ih"].T, params["w_hh"].T

    def step(h, x_t):
        gi = jnp.dot(x_t, wih_t, precision=hi) + params["b_ih"]
        gh = jnp.dot(h, whh_t, precision=hi) + params["b_hh"]
        i_r, i_z, i_n = jnp.split(gi, 3, axis=-1)
        h_r, h_z, h_n = jnp.split(gh, 3, axis=-1)
        r = jax.nn.sigmoid(i_r + h_r)
        z = jax.nn.sigmoid(i_z + h_z)
        n = jnp.tanh(i_n + r * h_n)
        h_new = (1.0 - z) * n + z * h
        return h_new, h_new

    h0 = jnp.zeros((B, HID), jnp.float32)
    h_last, outs = jax.lax.scan(step, h0, jnp.transpose(emb, (1, 0, 2)))
    out = jnp.transpose(outs, (1, 0, 2))
    y = jnp.dot(out.reshape(B * T, HID), params["w_out"], precision=hi) + params["b_out"]
    return y.reshape(B, T, HID), h_last[None]


# ----------------------------- main -----------------------------

if __name__ == "__main__":
    B, T = 2, 4                       # small batch, sequence of 4 "digit images"
    key = jax.random.PRNGKey(0)
    ks = jax.random.split(key, 9)

    def u(k, shape, fan_in):
        bound = 1.0 / float(fan_in) ** 0.5
        return jax.random.uniform(k, shape, jnp.float32, -bound, bound)

    # Deterministic parameter init (PyTorch-default-style uniform ranges).
    params = {
        "w_in":  u(ks[0], (IN_FEATURES, EMB), IN_FEATURES),   # Linear(784,100), (in,out)
        "b_in":  u(ks[1], (EMB,), IN_FEATURES),
        "w_ih":  u(ks[2], (3 * HID, EMB), HID),               # GRU weight_ih_l0, [r,z,n]
        "w_hh":  u(ks[3], (3 * HID, HID), HID),               # GRU weight_hh_l0
        "b_ih":  u(ks[4], (3 * HID,), HID),
        "b_hh":  u(ks[5], (3 * HID,), HID),
        "w_out": u(ks[6], (HID, HID), HID),                   # Linear(10,10), (in,out)
        "b_out": u(ks[7], (HID,), HID),
    }
    x = jax.random.uniform(ks[8], (B, T, IN_FEATURES), jnp.float32)

    kparams = preprocess_params(params)           # one-time, outside jit
    fwd = jax.jit(net_forward)
    out, h_n = fwd(kparams, x)
    out = jax.block_until_ready(out)
    h_n = jax.block_until_ready(h_n)

    ref_out, ref_h = reference(params, x)
    assert out.shape == (B, T, HID) and h_n.shape == (1, B, HID)
    assert jnp.allclose(out, ref_out, rtol=1e-3, atol=1e-3), "output mismatch"
    assert jnp.allclose(h_n, ref_h, rtol=1e-3, atol=1e-3), "hidden mismatch"

    print("KERNEL_OK")
</pallas_src>

<mosaic_0001>
module attributes {stable_mosaic.version = 11 : i64} {
  func.func @_net_kernel(%arg0: i32, %arg1: memref<8x784xf32, #tpu.memory_space<vmem>>, %arg2: memref<784x30xf32, #tpu.memory_space<vmem>>, %arg3: memref<24x30xf32, #tpu.memory_space<vmem>>, %arg4: memref<8x10xf32, #tpu.memory_space<vmem>>, %arg5: memref<2x10xf32, #tpu.memory_space<vmem>>) attributes {dimension_semantics = [#tpu.dimension_semantics<arbitrary>], iteration_bounds = array<i64: 1>, scalar_prefetch = 0 : i64, scratch_operands = 0 : i64, tpu.core_type = #tpu.core_type<tc>, window_params = [{pipeline_mode = #tpu.pipeline_mode<synchronous>, transform_indices = @transform_0, window_bounds = array<i64: 8, 784>}, {pipeline_mode = #tpu.pipeline_mode<synchronous>, transform_indices = @transform_1, window_bounds = array<i64: 784, 30>}, {pipeline_mode = #tpu.pipeline_mode<synchronous>, transform_indices = @transform_2, window_bounds = array<i64: 24, 30>}, {pipeline_mode = #tpu.pipeline_mode<synchronous>, transform_indices = @transform_3, window_bounds = array<i64: 8, 10>}, {pipeline_mode = #tpu.pipeline_mode<synchronous>, transform_indices = @transform_4, window_bounds = array<i64: 2, 10>}]} {
    %c0 = arith.constant 0 : index
    %c0_0 = arith.constant 0 : index
    %0 = vector.load %arg3[%c0, %c0_0] : memref<24x30xf32, #tpu.memory_space<vmem>>, vector<10x30xf32>
    %c10 = arith.constant 10 : index
    %c0_1 = arith.constant 0 : index
    %1 = vector.load %arg3[%c10, %c0_1] : memref<24x30xf32, #tpu.memory_space<vmem>>, vector<1x30xf32>
    %c11 = arith.constant 11 : index
    %c0_2 = arith.constant 0 : index
    %2 = vector.load %arg3[%c11, %c0_2] : memref<24x30xf32, #tpu.memory_space<vmem>>, vector<1x30xf32>
    %c12 = arith.constant 12 : index
    %c0_3 = arith.constant 0 : index
    %3 = vector.load %arg3[%c12, %c0_3] : memref<24x30xf32, #tpu.memory_space<vmem>>, vector<10x10xf32>
    %c22 = arith.constant 22 : index
    %c0_4 = arith.constant 0 : index
    %4 = vector.load %arg3[%c22, %c0_4] : memref<24x30xf32, #tpu.memory_space<vmem>>, vector<1x10xf32>
    %c0_5 = arith.constant 0 : index
    %c0_6 = arith.constant 0 : index
    %5 = vector.load %arg1[%c0_5, %c0_6] : memref<8x784xf32, #tpu.memory_space<vmem>>, vector<8x784xf32>
    %c0_7 = arith.constant 0 : index
    %c0_8 = arith.constant 0 : index
    %6 = vector.load %arg2[%c0_7, %c0_8] : memref<784x30xf32, #tpu.memory_space<vmem>>, vector<784x30xf32>
    %cst = arith.constant dense<0.000000e+00> : vector<8x30xf32>
    %7 = tpu.matmul %5, %6, %cst {dimension_numbers = #tpu.dot_dimension_numbers<[1], [0], [0], [1], [0, 0, 1, 1], [], []>} : vector<8x784xf32>, vector<784x30xf32>, vector<8x30xf32> -> vector<8x30xf32>
    %8 = vector.broadcast %2 : vector<1x30xf32> to vector<8x30xf32>
    %9 = arith.addf %7, %8 : vector<8x30xf32>
    %10 = vector.extract_strided_slice %9 {offsets = [0, 0], sizes = [8, 10], strides = [1, 1]} : vector<8x30xf32> to vector<8x10xf32>
    %11 = vector.extract_strided_slice %9 {offsets = [0, 10], sizes = [8, 10], strides = [1, 1]} : vector<8x30xf32> to vector<8x10xf32>
    %12 = vector.extract_strided_slice %9 {offsets = [0, 20], sizes = [8, 10], strides = [1, 1]} : vector<8x30xf32> to vector<8x10xf32>
    %13 = tpu.iota {dimensions = array<i32: 0>} : vector<8x10xi32>
    %c4_i32 = arith.constant 4 : i32
    %c0_i32 = arith.constant 0 : i32
    %14 = arith.cmpi eq, %c4_i32, %c0_i32 : i32
    %c1_i32 = arith.constant 1 : i32
    %15 = arith.select %14, %c1_i32, %c4_i32 : i32
    %16 = vector.broadcast %15 : i32 to vector<8x10xi32>
    %17 = arith.remsi %13, %16 : vector<8x10xi32>
    %c0_i32_9 = arith.constant 0 : i32
    %18 = vector.broadcast %c0_i32_9 : i32 to vector<8x10xi32>
    %19 = arith.cmpi ne, %17, %18 : vector<8x10xi32>
    %c0_i32_10 = arith.constant 0 : i32
    %20 = vector.broadcast %c0_i32_10 : i32 to vector<8x10xi32>
    %21 = arith.cmpi slt, %17, %20 : vector<8x10xi32>
    %c0_i32_11 = arith.constant 0 : i32
    %22 = arith.cmpi slt, %15, %c0_i32_11 : i32
    %23 = vector.broadcast %22 : i1 to vector<8x10xi1>
    %24 = vector.broadcast %23 : vector<8x10xi1> to vector<8x10xi1>
    %25 = arith.xori %21, %24 : vector<8x10xi1>
    %26 = arith.andi %25, %19 : vector<8x10xi1>
    %27 = vector.broadcast %15 : i32 to vector<8x10xi32>
    %28 = arith.addi %17, %27 : vector<8x10xi32>
    %29 = arith.select %26, %28, %17 : vector<8x10xi1>, vector<8x10xi32>
    %cst_12 = arith.constant 0.000000e+00 : f32
    %30 = vector.broadcast %cst_12 : f32 to vector<8x10xf32>
    %c1_i32_13 = arith.constant 1 : i32
    %31 = tpu.dynamic_rotate %30 by %c1_i32_13 dim 0 : vector<8x10xf32>, i32 -> vector<8x10xf32>
    %cst_14 = arith.constant dense<0.000000e+00> : vector<8x30xf32>
    %32 = tpu.matmul %31, %0, %cst_14 {dimension_numbers = #tpu.dot_dimension_numbers<[1], [0], [0], [1], [0, 0, 1, 1], [], []>} : vector<8x10xf32>, vector<10x30xf32>, vector<8x30xf32> -> vector<8x30xf32>
    %33 = vector.broadcast %1 : vector<1x30xf32> to vector<8x30xf32>
    %34 = arith.addf %32, %33 : vector<8x30xf32>
    %35 = vector.extract_strided_slice %34 {offsets = [0, 0], sizes = [8, 10], strides = [1, 1]} : vector<8x30xf32> to vector<8x10xf32>
    %36 = arith.addf %10, %35 : vector<8x10xf32>
    %37 = arith.negf %36 : vector<8x10xf32>
    %38 = math.exp %37 : vector<8x10xf32>
    %cst_15 = arith.constant 1.000000e+00 : f32
    %39 = vector.broadcast %cst_15 : f32 to vector<8x10xf32>
    %40 = arith.addf %39, %38 : vector<8x10xf32>
    %41 = arith.divf %39, %40 : vector<8x10xf32>
    %42 = vector.extract_strided_slice %34 {offsets = [0, 10], sizes = [8, 10], strides = [1, 1]} : vector<8x30xf32> to vector<8x10xf32>
    %43 = arith.addf %11, %42 : vector<8x10xf32>
    %44 = arith.negf %43 : vector<8x10xf32>
    %45 = math.exp %44 : vector<8x10xf32>
    %cst_16 = arith.constant 1.000000e+00 : f32
    %46 = vector.broadcast %cst_16 : f32 to vector<8x10xf32>
    %47 = arith.addf %46, %45 : vector<8x10xf32>
    %48 = arith.divf %46, %47 : vector<8x10xf32>
    %49 = vector.extract_strided_slice %34 {offsets = [0, 20], sizes = [8, 10], strides = [1, 1]} : vector<8x30xf32> to vector<8x10xf32>
    %50 = arith.mulf %41, %49 : vector<8x10xf32>
    %51 = arith.addf %12, %50 : vector<8x10xf32>
    %52 = math.tanh %51 : vector<8x10xf32>
    %cst_17 = arith.constant 1.000000e+00 : f32
    %53 = vector.broadcast %cst_17 : f32 to vector<8x10xf32>
    %54 = arith.subf %53, %48 : vector<8x10xf32>
    %55 = arith.mulf %54, %52 : vector<8x10xf32>
    %56 = arith.mulf %48, %31 : vector<8x10xf32>
    %57 = arith.addf %55, %56 : vector<8x10xf32>
    %c0_i32_18 = arith.constant 0 : i32
    %58 = vector.broadcast %c0_i32_18 : i32 to vector<8x10xi32>
    %59 = arith.cmpi eq, %29, %58 : vector<8x10xi32>
    %60 = arith.select %59, %57, %30 : vector<8x10xi1>, vector<8x10xf32>
    %c1_i32_19 = arith.constant 1 : i32
    %61 = tpu.dynamic_rotate %60 by %c1_i32_19 dim 0 : vector<8x10xf32>, i32 -> vector<8x10xf32>
    %cst_20 = arith.constant dense<0.000000e+00> : vector<8x30xf32>
    %62 = tpu.matmul %61, %0, %cst_20 {dimension_numbers = #tpu.dot_dimension_numbers<[1], [0], [0], [1], [0, 0, 1, 1], [], []>} : vector<8x10xf32>, vector<10x30xf32>, vector<8x30xf32> -> vector<8x30xf32>
    %63 = vector.broadcast %1 : vector<1x30xf32> to vector<8x30xf32>
    %64 = arith.addf %62, %63 : vector<8x30xf32>
    %65 = vector.extract_strided_slice %64 {offsets = [0, 0], sizes = [8, 10], strides = [1, 1]} : vector<8x30xf32> to vector<8x10xf32>
    %66 = arith.addf %10, %65 : vector<8x10xf32>
    %67 = arith.negf %66 : vector<8x10xf32>
    %68 = math.exp %67 : vector<8x10xf32>
    %cst_21 = arith.constant 1.000000e+00 : f32
    %69 = vector.broadcast %cst_21 : f32 to vector<8x10xf32>
    %70 = arith.addf %69, %68 : vector<8x10xf32>
    %71 = arith.divf %69, %70 : vector<8x10xf32>
    %72 = vector.extract_strided_slice %64 {offsets = [0, 10], sizes = [8, 10], strides = [1, 1]} : vector<8x30xf32> to vector<8x10xf32>
    %73 = arith.addf %11, %72 : vector<8x10xf32>
    %74 = arith.negf %73 : vector<8x10xf32>
    %75 = math.exp %74 : vector<8x10xf32>
    %cst_22 = arith.constant 1.000000e+00 : f32
    %76 = vector.broadcast %cst_22 : f32 to vector<8x10xf32>
    %77 = arith.addf %76, %75 : vector<8x10xf32>
    %78 = arith.divf %76, %77 : vector<8x10xf32>
    %79 = vector.extract_strided_slice %64 {offsets = [0, 20], sizes = [8, 10], strides = [1, 1]} : vector<8x30xf32> to vector<8x10xf32>
    %80 = arith.mulf %71, %79 : vector<8x10xf32>
    %81 = arith.addf %12, %80 : vector<8x10xf32>
    %82 = math.tanh %81 : vector<8x10xf32>
    %cst_23 = arith.constant 1.000000e+00 : f32
    %83 = vector.broadcast %cst_23 : f32 to vector<8x10xf32>
    %84 = arith.subf %83, %78 : vector<8x10xf32>
    %85 = arith.mulf %84, %82 : vector<8x10xf32>
    %86 = arith.mulf %78, %61 : vector<8x10xf32>
    %87 = arith.addf %85, %86 : vector<8x10xf32>
    %c1_i32_24 = arith.constant 1 : i32
    %88 = vector.broadcast %c1_i32_24 : i32 to vector<8x10xi32>
    %89 = arith.cmpi eq, %29, %88 : vector<8x10xi32>
    %90 = arith.select %89, %87, %60 : vector<8x10xi1>, vector<8x10xf32>
    %c1_i32_25 = arith.constant 1 : i32
    %91 = tpu.dynamic_rotate %90 by %c1_i32_25 dim 0 : vector<8x10xf32>, i32 -> vector<8x10xf32>
    %cst_26 = arith.constant dense<0.000000e+00> : vector<8x30xf32>
    %92 = tpu.matmul %91, %0, %cst_26 {dimension_numbers = #tpu.dot_dimension_numbers<[1], [0], [0], [1], [0, 0, 1, 1], [], []>} : vector<8x10xf32>, vector<10x30xf32>, vector<8x30xf32> -> vector<8x30xf32>
    %93 = vector.broadcast %1 : vector<1x30xf32> to vector<8x30xf32>
    %94 = arith.addf %92, %93 : vector<8x30xf32>
    %95 = vector.extract_strided_slice %94 {offsets = [0, 0], sizes = [8, 10], strides = [1, 1]} : vector<8x30xf32> to vector<8x10xf32>
    %96 = arith.addf %10, %95 : vector<8x10xf32>
    %97 = arith.negf %96 : vector<8x10xf32>
    %98 = math.exp %97 : vector<8x10xf32>
    %cst_27 = arith.constant 1.000000e+00 : f32
    %99 = vector.broadcast %cst_27 : f32 to vector<8x10xf32>
    %100 = arith.addf %99, %98 : vector<8x10xf32>
    %101 = arith.divf %99, %100 : vector<8x10xf32>
    %102 = vector.extract_strided_slice %94 {offsets = [0, 10], sizes = [8, 10], strides = [1, 1]} : vector<8x30xf32> to vector<8x10xf32>
    %103 = arith.addf %11, %102 : vector<8x10xf32>
    %104 = arith.negf %103 : vector<8x10xf32>
    %105 = math.exp %104 : vector<8x10xf32>
    %cst_28 = arith.constant 1.000000e+00 : f32
    %106 = vector.broadcast %cst_28 : f32 to vector<8x10xf32>
    %107 = arith.addf %106, %105 : vector<8x10xf32>
    %108 = arith.divf %106, %107 : vector<8x10xf32>
    %109 = vector.extract_strided_slice %94 {offsets = [0, 20], sizes = [8, 10], strides = [1, 1]} : vector<8x30xf32> to vector<8x10xf32>
    %110 = arith.mulf %101, %109 : vector<8x10xf32>
    %111 = arith.addf %12, %110 : vector<8x10xf32>
    %112 = math.tanh %111 : vector<8x10xf32>
    %cst_29 = arith.constant 1.000000e+00 : f32
    %113 = vector.broadcast %cst_29 : f32 to vector<8x10xf32>
    %114 = arith.subf %113, %108 : vector<8x10xf32>
    %115 = arith.mulf %114, %112 : vector<8x10xf32>
    %116 = arith.mulf %108, %91 : vector<8x10xf32>
    %117 = arith.addf %115, %116 : vector<8x10xf32>
    %c2_i32 = arith.constant 2 : i32
    %118 = vector.broadcast %c2_i32 : i32 to vector<8x10xi32>
    %119 = arith.cmpi eq, %29, %118 : vector<8x10xi32>
    %120 = arith.select %119, %117, %90 : vector<8x10xi1>, vector<8x10xf32>
    %c1_i32_30 = arith.constant 1 : i32
    %121 = tpu.dynamic_rotate %120 by %c1_i32_30 dim 0 : vector<8x10xf32>, i32 -> vector<8x10xf32>
    %cst_31 = arith.constant dense<0.000000e+00> : vector<8x30xf32>
    %122 = tpu.matmul %121, %0, %cst_31 {dimension_numbers = #tpu.dot_dimension_numbers<[1], [0], [0], [1], [0, 0, 1, 1], [], []>} : vector<8x10xf32>, vector<10x30xf32>, vector<8x30xf32> -> vector<8x30xf32>
    %123 = vector.broadcast %1 : vector<1x30xf32> to vector<8x30xf32>
    %124 = arith.addf %122, %123 : vector<8x30xf32>
    %125 = vector.extract_strided_slice %124 {offsets = [0, 0], sizes = [8, 10], strides = [1, 1]} : vector<8x30xf32> to vector<8x10xf32>
    %126 = arith.addf %10, %125 : vector<8x10xf32>
    %127 = arith.negf %126 : vector<8x10xf32>
    %128 = math.exp %127 : vector<8x10xf32>
    %cst_32 = arith.constant 1.000000e+00 : f32
    %129 = vector.broadcast %cst_32 : f32 to vector<8x10xf32>
    %130 = arith.addf %129, %128 : vector<8x10xf32>
    %131 = arith.divf %129, %130 : vector<8x10xf32>
    %132 = vector.extract_strided_slice %124 {offsets = [0, 10], sizes = [8, 10], strides = [1, 1]} : vector<8x30xf32> to vector<8x10xf32>
    %133 = arith.addf %11, %132 : vector<8x10xf32>
    %134 = arith.negf %133 : vector<8x10xf32>
    %135 = math.exp %134 : vector<8x10xf32>
    %cst_33 = arith.constant 1.000000e+00 : f32
    %136 = vector.broadcast %cst_33 : f32 to vector<8x10xf32>
    %137 = arith.addf %136, %135 : vector<8x10xf32>
    %138 = arith.divf %136, %137 : vector<8x10xf32>
    %139 = vector.extract_strided_slice %124 {offsets = [0, 20], sizes = [8, 10], strides = [1, 1]} : vector<8x30xf32> to vector<8x10xf32>
    %140 = arith.mulf %131, %139 : vector<8x10xf32>
    %141 = arith.addf %12, %140 : vector<8x10xf32>
    %142 = math.tanh %141 : vector<8x10xf32>
    %cst_34 = arith.constant 1.000000e+00 : f32
    %143 = vector.broadcast %cst_34 : f32 to vector<8x10xf32>
    %144 = arith.subf %143, %138 : vector<8x10xf32>
    %145 = arith.mulf %144, %142 : vector<8x10xf32>
    %146 = arith.mulf %138, %121 : vector<8x10xf32>
    %147 = arith.addf %145, %146 : vector<8x10xf32>
    %c3_i32 = arith.constant 3 : i32
    %148 = vector.broadcast %c3_i32 : i32 to vector<8x10xi32>
    %149 = arith.cmpi eq, %29, %148 : vector<8x10xi32>
    %150 = arith.select %149, %147, %120 : vector<8x10xi1>, vector<8x10xf32>
    %cst_35 = arith.constant dense<0.000000e+00> : vector<8x10xf32>
    %151 = tpu.matmul %150, %3, %cst_35 {dimension_numbers = #tpu.dot_dimension_numbers<[1], [0], [0], [1], [0, 0, 1, 1], [], []>} : vector<8x10xf32>, vector<10x10xf32>, vector<8x10xf32> -> vector<8x10xf32>
    %152 = vector.broadcast %4 : vector<1x10xf32> to vector<8x10xf32>
    %153 = arith.addf %151, %152 : vector<8x10xf32>
    %c0_36 = arith.constant 0 : index
    %c0_37 = arith.constant 0 : index
    %154 = vector.load %arg4[%c0_36, %c0_37] : memref<8x10xf32, #tpu.memory_space<vmem>>, vector<8x10xf32>
    tpu.vector_store %arg4[%c0_36, %c0_37], %153 {strides = array<i32>} : memref<8x10xf32, #tpu.memory_space<vmem>>, vector<8x10xf32>,
    %155 = tpu.iota {dimensions = array<i32: 0>} : vector<2x8xi32>
    %156 = tpu.iota {dimensions = array<i32: 1>} : vector<2x8xi32>
    %c4_i32_38 = arith.constant 4 : i32
    %157 = vector.broadcast %c4_i32_38 : i32 to vector<2x8xi32>
    %158 = arith.muli %155, %157 : vector<2x8xi32>
    %c3_i32_39 = arith.constant 3 : i32
    %159 = vector.broadcast %c3_i32_39 : i32 to vector<2x8xi32>
    %160 = arith.addi %158, %159 : vector<2x8xi32>
    %161 = arith.cmpi eq, %156, %160 : vector<2x8xi32>
    %cst_40 = arith.constant 1.000000e+00 : f32
    %cst_41 = arith.constant 0.000000e+00 : f32
    %162 = vector.broadcast %cst_40 : f32 to vector<2x8xf32>
    %163 = vector.broadcast %cst_41 : f32 to vector<2x8xf32>
    %164 = arith.select %161, %162, %163 : vector<2x8xi1>, vector<2x8xf32>
    %cst_42 = arith.constant dense<0.000000e+00> : vector<2x10xf32>
    %165 = tpu.matmul %164, %150, %cst_42 {dimension_numbers = #tpu.dot_dimension_numbers<[1], [0], [0], [1], [0, 0, 1, 1], [], []>} : vector<2x8xf32>, vector<8x10xf32>, vector<2x10xf32> -> vector<2x10xf32>
    %c0_43 = arith.constant 0 : index
    %c0_44 = arith.constant 0 : index
    %166 = vector.load %arg5[%c0_43, %c0_44] : memref<2x10xf32, #tpu.memory_space<vmem>>, vector<2x10xf32>
    tpu.vector_store %arg5[%c0_43, %c0_44], %165 {strides = array<i32>} : memref<2x10xf32, #tpu.memory_space<vmem>>, vector<2x10xf32>,
    return
  }
  func.func @transform_0(%arg0: i32) -> (i32, i32) {
    %c0_i32 = arith.constant 0 : i32
    %c0_i32_0 = arith.constant 0 : i32
    %c0_i32_1 = arith.constant 0 : i32
    return %c0_i32, %c0_i32_0 : i32, i32
  }
  func.func @transform_1(%arg0: i32) -> (i32, i32) {
    %c0_i32 = arith.constant 0 : i32
    %c0_i32_0 = arith.constant 0 : i32
    %c0_i32_1 = arith.constant 0 : i32
    return %c0_i32, %c0_i32_0 : i32, i32
  }
  func.func @transform_2(%arg0: i32) -> (i32, i32) {
    %c0_i32 = arith.constant 0 : i32
    %c0_i32_0 = arith.constant 0 : i32
    %c0_i32_1 = arith.constant 0 : i32
    return %c0_i32, %c0_i32_0 : i32, i32
  }
  func.func @transform_3(%arg0: i32) -> (i32, i32) {
    %c0_i32 = arith.constant 0 : i32
    %c0_i32_0 = arith.constant 0 : i32
    %c0_i32_1 = arith.constant 0 : i32
    return %c0_i32, %c0_i32_0 : i32, i32
  }
  func.func @transform_4(%arg0: i32) -> (i32, i32) {
    %c0_i32 = arith.constant 0 : i32
    %c0_i32_0 = arith.constant 0 : i32
    %c0_i32_1 = arith.constant 0 : i32
    return %c0_i32, %c0_i32_0 : i32, i32
  }
}

</mosaic_0001>

<bundles_post_ra>
// kernel: net_forward.1
= control target key start
LH: loop header
LB: loop body
LE: loop exit
PB: predicated region body
PF: predicated region fallthrough
CT: control target
= control target key end

     0   :  { %10 = vsyncpa [#allocation3], 0  ;;  %s1807_s0 = inlined_call_operand.vmem [shape: f32[8,784], index: 0, kind: input, shape index: {}]   ;;  %s1808_s1 = inlined_call_operand.vmem [shape: f32[784,30], index: 1, kind: input, shape index: {}]   ;;  %s1809_s2 = inlined_call_operand.vmem [shape: f32[24,30], index: 2, kind: input, shape index: {}]   ;;  %s1810_s3 = inlined_call_operand.hbm [shape: f32[8,10], index: 3, kind: output, shape index: {0}]   ;;  %s1811_s4 = inlined_call_operand.hbm [shape: f32[2,10], index: 4, kind: output, shape index: {1}]  }
   0x1   :  { %v63_v0 = vld [vmem:[%s1808_s1 + $0xf8] sm:$0xff]  ;;  %v62_v4 = vld [vmem:[%s1808_s1 + $0xf0] sm:$0xff]  ;;  %v61_v8 = vld [vmem:[%s1808_s1 + $0xe8] sm:$0xff] }
   0x2   :  { %v95_v1 = vld [vmem:[%s1808_s1 + $0x1f8] sm:$0xff]  ;;  %1084 = vmatprep.subr.mxu0 %v63_v0  ;;  %v94_v5 = vld [vmem:[%s1808_s1 + $0x1f0] sm:$0xff]  ;;  %v93_v9 = vld [vmem:[%s1808_s1 + $0x1e8] sm:$0xff] }
   0x3   :  { %v47_v2 = vld [vmem:[%s1808_s1 + $0x78] sm:$0xff]  ;;  %1119 = vmatprep.subr.mxu1 %v95_v1  ;;  %v46_v6 = vld [vmem:[%s1808_s1 + $0x70] sm:$0xff]  ;;  %v45_v10 = vld [vmem:[%s1808_s1 + $0x68] sm:$0xff] }
   0x4   :  { %v79_v3 = vld [vmem:[%s1808_s1 + $0x178] sm:$0xff]  ;;  %1085 = vmatpush3.msra.mxu0 %v47_v2  ;;  %v78_v7 = vld [vmem:[%s1808_s1 + $0x170] sm:$0xff]  ;;  %v77_v11 = vld [vmem:[%s1808_s1 + $0x168] sm:$0xff] }
   0x5   :  { %1120 = vmatpush3.msra.mxu1 %v79_v3  ;;  %1086 = vmatprep.subr.mxu0 %v62_v4  ;;  %v60_v12 = vld [vmem:[%s1808_s1 + $0xe0] sm:$0xff]  ;;  %v59_v16 = vld [vmem:[%s1808_s1 + $0xd8] sm:$0xff]  ;;  %v58_v20 = vld [vmem:[%s1808_s1 + $0xd0] sm:$0xff] }
   0x6   :  { %1121 = vmatprep.subr.mxu1 %v94_v5  ;;  %1087 = vmatpush3.msra.mxu0 %v46_v6  ;;  %v92_v13 = vld [vmem:[%s1808_s1 + $0x1e0] sm:$0xff]  ;;  %v91_v17 = vld [vmem:[%s1808_s1 + $0x1d8] sm:$0xff]  ;;  %v90_v21 = vld [vmem:[%s1808_s1 + $0x1d0] sm:$0xff] }
   0x7   :  { %1122 = vmatpush3.msra.mxu1 %v78_v7  ;;  %1088 = vmatprep.subr.mxu0 %v61_v8  ;;  %v44_v14 = vld [vmem:[%s1808_s1 + $0x60] sm:$0xff]  ;;  %v43_v18 = vld [vmem:[%s1808_s1 + $0x58] sm:$0xff]  ;;  %v42_v22 = vld [vmem:[%s1808_s1 + $0x50] sm:$0xff]  ;;  %v1332_v8 = vmov 0.0  }
   0x8   :  { %1123 = vmatprep.subr.mxu1 %v93_v9  ;;  %v76_v15 = vld [vmem:[%s1808_s1 + $0x160] sm:$0xff]  ;;  %1089 = vmatpush3.msra.mxu0 %v45_v10  ;;  %v75_v19 = vld [vmem:[%s1808_s1 + $0x158] sm:$0xff]  ;;  %v74_v23 = vld [vmem:[%s1808_s1 + $0x150] sm:$0xff] }
   0x9   :  { %1124 = vmatpush3.msra.mxu1 %v77_v11  ;;  %1090 = vmatprep.subr.mxu0 %v60_v12  ;;  %v57_v24 = vld [vmem:[%s1808_s1 + $0xc8] sm:$0xff]  ;;  %v56_v28 = vld [vmem:[%s1808_s1 + $0xc0] sm:$0xff]  ;;  %v55_v32 = vld [vmem:[%s1808_s1 + $0xb8] sm:$0xff] }
   0xa   :  { %1125 = vmatprep.subr.mxu1 %v92_v13  ;;  %1091 = vmatpush3.msra.mxu0 %v44_v14  ;;  %v89_v25 = vld [vmem:[%s1808_s1 + $0x1c8] sm:$0xff]  ;;  %v88_v29 = vld [vmem:[%s1808_s1 + $0x1c0] sm:$0xff]  ;;  %v87_v33 = vld [vmem:[%s1808_s1 + $0x1b8] sm:$0xff] }
   0xb   :  { %1126 = vmatpush3.msra.mxu1 %v76_v15  ;;  %1092 = vmatprep.subr.mxu0 %v59_v16  ;;  %v41_v26 = vld [vmem:[%s1808_s1 + $0x48] sm:$0xff]  ;;  %v40_v30 = vld [vmem:[%s1808_s1 + $0x40] sm:$0xff]  ;;  %v39_v34 = vld [vmem:[%s1808_s1 + $0x38] sm:$0xff] }
   0xc   :  { %1127 = vmatprep.subr.mxu1 %v91_v17  ;;  %1093 = vmatpush3.msra.mxu0 %v43_v18  ;;  %v73_v27 = vld [vmem:[%s1808_s1 + $0x148] sm:$0xff]  ;;  %v72_v31 = vld [vmem:[%s1808_s1 + $0x140] sm:$0xff]  ;;  %v71_v35 = vld [vmem:[%s1808_s1 + $0x138] sm:$0xff] }
   0xd   :  { %1128 = vmatpush3.msra.mxu1 %v75_v19  ;;  %1094 = vmatprep.subr.mxu0 %v58_v20  ;;  %v54_v36 = vld [vmem:[%s1808_s1 + $0xb0] sm:$0xff]  ;;  %v53_v40 = vld [vmem:[%s1808_s1 + $0xa8] sm:$0xff]  ;;  %v52_v44 = vld [vmem:[%s1808_s1 + $0xa0] sm:$0xff] }
   0xe   :  { %1129 = vmatprep.subr.mxu1 %v90_v21  ;;  %1095 = vmatpush3.msra.mxu0 %v42_v22  ;;  %v86_v37 = vld [vmem:[%s1808_s1 + $0x1b0] sm:$0xff]  ;;  %v85_v41 = vld [vmem:[%s1808_s1 + $0x1a8] sm:$0xff]  ;;  %v84_v45 = vld [vmem:[%s1808_s1 + $0x1a0] sm:$0xff] }
   0xf   :  { %1130 = vmatpush3.msra.mxu1 %v74_v23  ;;  %1096 = vmatprep.subr.mxu0 %v57_v24  ;;  %v38_v38 = vld [vmem:[%s1808_s1 + $0x30] sm:$0xff]  ;;  %v37_v42 = vld [vmem:[%s1808_s1 + $0x28] sm:$0xff]  ;;  %v36_v46 = vld [vmem:[%s1808_s1 + $0x20] sm:$0xff] }
  0x10   :  { %1131 = vmatprep.subr.mxu1 %v89_v25  ;;  %1097 = vmatpush3.msra.mxu0 %v41_v26  ;;  %v70_v39 = vld [vmem:[%s1808_s1 + $0x130] sm:$0xff]  ;;  %v69_v43 = vld [vmem:[%s1808_s1 + $0x128] sm:$0xff]  ;;  %v68_v47 = vld [vmem:[%s1808_s1 + $0x120] sm:$0xff] }
  0x11   :  { %1132 = vmatpush3.msra.mxu1 %v73_v27  ;;  %1098 = vmatprep.subr.mxu0 %v56_v28  ;;  %v51_v48 = vld [vmem:[%s1808_s1 + $0x98] sm:$0xff]  ;;  %v50_v52 = vld [vmem:[%s1808_s1 + $0x90] sm:$0xff]  ;;  %v49_v56 = vld [vmem:[%s1808_s1 + $0x88] sm:$0xff] }
  0x12   :  { %1133 = vmatprep.subr.mxu1 %v88_v29  ;;  %1099 = vmatpush3.msra.mxu0 %v40_v30  ;;  %v83_v49 = vld [vmem:[%s1808_s1 + $0x198] sm:$0xff]  ;;  %v82_v53 = vld [vmem:[%s1808_s1 + $0x190] sm:$0xff]  ;;  %v81_v57 = vld [vmem:[%s1808_s1 + $0x188] sm:$0xff] }
  0x13   :  { %1134 = vmatpush3.msra.mxu1 %v72_v31  ;;  %1100 = vmatprep.subr.mxu0 %v55_v32  ;;  %v35_v50 = vld [vmem:[%s1808_s1 + $0x18] sm:$0xff]  ;;  %v34_v54 = vld [vmem:[%s1808_s1 + $0x10] sm:$0xff]  ;;  %v33_v58 = vld [vmem:[%s1808_s1 + $0x8] sm:$0xff] }
  0x14   :  { %1135 = vmatprep.subr.mxu1 %v87_v33  ;;  %1101 = vmatpush3.msra.mxu0 %v39_v34  ;;  %v67_v51 = vld [vmem:[%s1808_s1 + $0x118] sm:$0xff]  ;;  %v66_v55 = vld [vmem:[%s1808_s1 + $0x110] sm:$0xff]  ;;  %v65_v59 = vld [vmem:[%s1808_s1 + $0x108] sm:$0xff] }
  0x15   :  { %1136 = vmatpush3.msra.mxu1 %v71_v35  ;;  %1102 = vmatprep.subr.mxu0 %v54_v36  ;;  %v48_v60 = vld [vmem:[%s1808_s1 + $0x80] sm:$0xff]  ;;  %v26_v63 = vld [vmem:[%s1807_s0 + $0x8] sm:$0xff]  ;;  %v28_v1 = vld [vmem:[%s1807_s0 + $0x18] sm:$0xff] }
  0x16   :  { %1137 = vmatprep.subr.mxu1 %v86_v37  ;;  %1103 = vmatpush3.msra.mxu0 %v38_v38  ;;  %v80_v61 = vld [vmem:[%s1808_s1 + $0x180] sm:$0xff]  ;;  %v27_v3 = vld [vmem:[%s1807_s0 + $0x10] sm:$0xff]  ;;  %v127_v4 = vld [vmem:[%s1808_s1 + $0x2f8] sm:$0xff] }
  0x17   :  { %1138 = vmatpush3.msra.mxu1 %v70_v39  ;;  %1104 = vmatprep.subr.mxu0 %v53_v40  ;;  %v32_v62 = vld [vmem:[%s1808_s1] sm:$0xff]  ;;  %v111_v5 = vld [vmem:[%s1808_s1 + $0x278] sm:$0xff]  ;;  %v129_v6 = vld [vmem:[%s1808_s1 + $0x308] sm:$0xff] }
  0x18   :  { %1139 = vmatprep.subr.mxu1 %v85_v41  ;;  %1105 = vmatpush3.msra.mxu0 %v37_v42  ;;  %v64_v0 = vld [vmem:[%s1808_s1 + $0x100] sm:$0xff]  ;;  %v126_v7 = vld [vmem:[%s1808_s1 + $0x2f0] sm:$0xff] }
  0x19   :  { %1140 = vmatpush3.msra.mxu1 %v69_v43  ;;  %1106 = vmatprep.subr.mxu0 %v52_v44  ;;  %v25_v2 = vld [vmem:[%s1807_s0] sm:$0xff]  ;;  %v110_v9 = vld [vmem:[%s1808_s1 + $0x270] sm:$0xff] }
  0x1a   :  { %1141 = vmatprep.subr.mxu1 %v84_v45  ;;  %1107 = vmatpush3.msra.mxu0 %v36_v46  ;;  %v128_v10 = vld [vmem:[%s1808_s1 + $0x300] sm:$0xff] }
  0x1b   :  { %1142 = vmatpush3.msra.mxu1 %v68_v47  ;;  %1108 = vmatprep.subr.mxu0 %v51_v48 }
  0x1c   :  { %1143 = vmatprep.subr.mxu1 %v83_v49  ;;  %1109 = vmatpush3.msra.mxu0 %v35_v50 }
  0x1d   :  { %1144 = vmatpush3.msra.mxu1 %v67_v51  ;;  %1110 = vmatprep.subr.mxu0 %v50_v52 }
  0x1e   :  { %1145 = vmatprep.subr.mxu1 %v82_v53  ;;  %1111 = vmatpush3.msra.mxu0 %v34_v54 }
  0x1f   :  { %1146 = vmatpush3.msra.mxu1 %v66_v55  ;;  %1112 = vmatprep.subr.mxu0 %v49_v56 }
  0x20   :  { %1147 = vmatprep.subr.mxu1 %v81_v57  ;;  %1113 = vmatpush3.msra.mxu0 %v33_v58 }
  0x21   :  { %1148 = vmatpush3.msra.mxu1 %v65_v59  ;;  %1114 = vmatprep.subr.mxu0 %v48_v60 }
  0x22   :  { %1149 = vmatprep.subr.mxu1 %v80_v61  ;;  %1115 = vmatpush3.msra.mxu0 %v32_v62 }
  0x23   :  { %202 = vmatprep.mubr.f32.mxu0 %v26_v63  ;;  %1150 = vmatpush3.msra.mxu1 %v64_v0 }
  0x24   :  { %272 = vmatprep.mubr.f32.mxu1 %v28_v1  ;;  %203 = vmatmul.mubr.f32.vlgmr.msra.gmra.mxu0 %v25_v2 }
  0x25   :  { %273 = vmatmul.mubr.f32.vlgmr.msra.gmra.mxu1 %v27_v3  ;;  %1154 = vmatprep.subr.mxu0 %v127_v4 }
  0x26   :  { %1209 = vmatprep.subr.mxu1 %v1332_v8 }
  0x27   :  { %11 = vsyncpa [#allocation5], 0  ;;  %1155 = vmatpush3.msra.mxu0 %v111_v5  ;;  %1210 = vmatpush3.msra.mxu1 %v129_v6  ;;  %v125_v11 = vld [vmem:[%s1808_s1 + $0x2e8] sm:$0xff]  ;;  %v31_v12 = vld [vmem:[%s1807_s0 + $0x30] sm:$0xff]  ;;  %vm134_vm0 = vcmask 130048   ;;  %vm440_vm1 = vcmask 1041408  }
  0x28   :  { %1156 = vmatprep.subr.mxu0 %v126_v7  ;;  %1211 = vmatprep.subr.mxu1 %v1332_v8  ;;  %v109_v13 = vld [vmem:[%s1808_s1 + $0x268] sm:$0xff]  ;;  %vm1333_vm2 = vmmov 0   ;;  %v124_v15 = vld [vmem:[%s1808_s1 + $0x2e0] sm:$0xff]  ;;  %v123_v18 = vld [vmem:[%s1808_s1 + $0x2d8] sm:$0xff]  ;;  %s1335_s24 = smov 20   ;;  %s1336_s25 = smov 118  }
  0x29   :  { %1157 = vmatpush3.msra.mxu0 %v110_v9  ;;  %1212 = vmatpush3.msra.mxu1 %v128_v10  ;;  %v1601_v14 = vld [vmem:[%s1809_s2 + $0x8] sm:$0x3]  ;;  %v108_v16 = vld [vmem:[%s1808_s1 + $0x260] sm:$0xff]  ;;  %v107_v19 = vld [vmem:[%s1808_s1 + $0x258] sm:$0xff]  ;;  %s1337_s26 = smov 10   ;;  %vm436_vm4 = vcmask 80896  }
  0x2a   :  { %1213 = vmatprep.mubr.msk.f32.mxu1 %vm1333_vm2, %v1332_v8  ;;  %1158 = vmatprep.subr.mxu0 %v125_v11  ;;  %v1615_v17 = vld [vmem:[%s1809_s2] sm:$0xff]  ;;  %v122_v20 = vld [vmem:[%s1808_s1 + $0x2d0] sm:$0xff]  ;;  %v30_v21 = vld [vmem:[%s1807_s0 + $0x28] sm:$0xff]  ;;  %v418_v11 = vlaneseq  ;;  %vm962_vm9 = vcmask 64512   ;;  %s1338_s7 = smov [#allocation2]   ;;  %s1339_s9 = smov [#allocation4]  }
  0x2b   :  { %1214 = vmatmul.mubr.msk.f32.vlgmr.msra.gmra.mxu1 %vm134_vm0, %v31_v12  ;;  %1216 = vmatprep.subr.mxu1 %v1332_v8  ;;  %v106_v22 = vld [vmem:[%s1808_s1 + $0x250] sm:$0xff]  ;;  %v121_v23 = vld [vmem:[%s1808_s1 + $0x2c8] sm:$0xff]  ;;  %v120_v25 = vld [vmem:[%s1808_s1 + $0x2c0] sm:$0xff]  ;;  %s1044_s8 = sshll.u32 %s1338_s7, 4  ;;  %s1054_s10 = sshll.u32 %s1339_s9, 4  ;;  %vm1036_vm10 = vcmask 74752   ;;  %s1045_s8 = int_to_ptr.vmem [resolvable:$true] %s1044_s8  ;;  %s1055_s10 = int_to_ptr.vmem [resolvable:$true] %s1054_s10 }
  0x2c   :  { %1159 = vmatpush3.msra.mxu0 %v109_v13  ;;  %1217 = vmatpush3.msk.msra.mxu1 %vm440_vm1, %v1601_v14  ;;  %v105_v24 = vld [vmem:[%s1808_s1 + $0x248] sm:$0xff]  ;;  %v104_v26 = vld [vmem:[%s1808_s1 + $0x240] sm:$0xff]  ;;  %v119_v27 = vld [vmem:[%s1808_s1 + $0x2b8] sm:$0xff]  ;;  %v1729_v12 = vshrl.u32 %v418_v11, 7  ;;  %s1288_s11 = scalar_lea.vmem %s1045_s8, 128  ;;  %p1293_p1 = scmp.lt.s32.totalorder %s1045_s8, %s1045_s8 }
  0x2d   :  { %1160 = vmatprep.subr.mxu0 %v124_v15  ;;  %1218 = vmatprep.subr.mxu1 %v1332_v8  ;;  %v103_v28 = vld [vmem:[%s1808_s1 + $0x238] sm:$0xff]  ;;  %v118_v29 = vld [vmem:[%s1808_s1 + $0x2b0] sm:$0xff]  ;;  %v117_v31 = vld [vmem:[%s1808_s1 + $0x2a8] sm:$0xff]  ;;  %p1289_p0 = scmp.ne.s32.totalorder %s1045_s8, %s1288_s11  ;;  %p1294_p2 = scmp.lt.s32.totalorder %s1288_s11, %s1288_s11 }
  0x2e   :  { %1161 = vmatpush3.msra.mxu0 %v108_v16  ;;  %1219 = vmatpush3.msra.mxu1 %v1615_v17  ;;  %v102_v30 = vld [vmem:[%s1808_s1 + $0x230] sm:$0xff]  ;;  %v101_v32 = vld [vmem:[%s1808_s1 + $0x228] sm:$0xff]  ;;  %v116_v33 = vld [vmem:[%s1808_s1 + $0x2a0] sm:$0xff]  ;;  %v1732_v15 = vand.u32 3, %v1729_v12 }
  0x2f   :  { %1220 = vmatprep.mubr.msk.f32.mxu1 %vm1333_vm2, %v1332_v8  ;;  %1162 = vmatprep.subr.mxu0 %v123_v18  ;;  %v100_v34 = vld [vmem:[%s1808_s1 + $0x220] sm:$0xff]  ;;  %v115_v35 = vld [vmem:[%s1808_s1 + $0x298] sm:$0xff]  ;;  %v114_v37 = vld [vmem:[%s1808_s1 + $0x290] sm:$0xff]  ;;  %p1295_p3 = por %p1294_p2, %p1293_p1 }
  0x30   :  { %1221 = vmatmul.mubr.f32.vlgmr.msra.gmra.mxu1 %v1332_v8  ;;  %1163 = vmatpush3.msra.mxu0 %v107_v19  ;;  %v99_v36 = vld [vmem:[%s1808_s1 + $0x218] sm:$0xff]  ;;  %v98_v38 = vld [vmem:[%s1808_s1 + $0x210] sm:$0xff]  ;;  %v113_v39 = vld [vmem:[%s1808_s1 + $0x288] sm:$0xff]  ;;  %vm543_vm3 = vcmp.eq.s32.totalorder %v1732_v15, 0  ;;  %vm652_vm5 = vcmp.eq.s32.totalorder %v1732_v15, 1  ;;  %vm761_vm6 = vcmp.eq.s32.totalorder %v1732_v15, 2 }
  0x31   :  { %1164 = vmatprep.subr.mxu0 %v122_v20  ;;  %342 = vmatprep.mubr.f32.mxu0 %v30_v21  ;;  %v97_v40 = vld [vmem:[%s1808_s1 + $0x208] sm:$0xff]  ;;  %v112_v41 = vld [vmem:[%s1808_s1 + $0x280] sm:$0xff]  ;;  %vm870_vm7 = vcmp.eq.s32.totalorder %v1732_v15, 3  ;;  %v1080_v15 = vld [vmem:[%s1809_s2 + $0x16] ss:$0 sm:$0xff]  ;;  %p1296_p4 = pnand %p1295_p3, %p1289_p0 }
  0x32   :  { %1165 = vmatpush3.msra.mxu0 %v106_v22  ;;  %1223 = vmatprep.subr.mxu1 %v1332_v8  ;;  %v96_v42 = vld [vmem:[%s1808_s1 + $0x200] sm:$0xff]  ;;  %v1713_v49 = vld [vmem:[%s1809_s2 + $0xa] ss:$0 sm:$0xff]  ;;  %s1334_s1 = smov 108   ;;  %v1066_v56 = vld [vmem:[%s1809_s2 + $0xb] ss:$0 sm:$0xff] }
  0x33   :  { %1166 = vmatprep.subr.mxu0 %v121_v23  ;;  %1224 = vmatpush3.msk.msra.mxu1 %vm440_vm1, %v1601_v14  ;;  %v29_v43 = vld [vmem:[%s1807_s0 + $0x20] sm:$0xff] }
  0x34   :  { %1167 = vmatpush3.msra.mxu0 %v105_v24  ;;  %1225 = vmatprep.subr.mxu1 %v1332_v8 }
  0x35   :  { %1168 = vmatprep.subr.mxu0 %v120_v25  ;;  %1226 = vmatpush3.msra.mxu1 %v1615_v17 }
  0x36   :  { %1169 = vmatpush3.msra.mxu0 %v104_v26  ;;  %1227 = vmatprep.mubr.msk.f32.mxu1 %vm1333_vm2, %v1332_v8 }
  0x37   :  { %1170 = vmatprep.subr.mxu0 %v119_v27  ;;  %1230 = vmatprep.subr.mxu1 %v1332_v8 }
  0x38   :  { %1171 = vmatpush3.msra.mxu0 %v103_v28 }
  0x39   :  { %1172 = vmatprep.subr.mxu0 %v118_v29 }
  0x3a   :  { %1173 = vmatpush3.msra.mxu0 %v102_v30 }
  0x3b   :  { %1174 = vmatprep.subr.mxu0 %v117_v31 }
  0x3c   :  { %1175 = vmatpush3.msra.mxu0 %v101_v32 }
  0x3d   :  { %1176 = vmatprep.subr.mxu0 %v116_v33 }
  0x3e   :  { %1177 = vmatpush3.msra.mxu0 %v100_v34 }
  0x3f   :  { %1178 = vmatprep.subr.mxu0 %v115_v35 }
  0x40   :  { %1179 = vmatpush3.msra.mxu0 %v99_v36 }
  0x41   :  { %1180 = vmatprep.subr.mxu0 %v114_v37 }
  0x42   :  { %1181 = vmatpush3.msra.mxu0 %v98_v38 }
  0x43   :  { %1182 = vmatprep.subr.mxu0 %v113_v39 }
  0x44   :  { %1183 = vmatpush3.msra.mxu0 %v97_v40 }
  0x45   :  { %1184 = vmatprep.subr.mxu0 %v112_v41 }
  0x46   :  { %1185 = vmatpush3.msra.mxu0 %v96_v42 }
  0x47   :  { %343 = vmatmul.mubr.f32.vlgmr.msra.gmra.mxu0 %v29_v43 }
  0xe4   :  { %v1116_v53 = vpop.f32.mrf.mxu0 }
  0xe5   :  { %v1151_v44 = vpop.f32.mrf.mxu1 }
  0xe6   :  { %v1117_v54 = vpop.f32.mrf.mxu0 }
  0xe7   :  { %v1152_v45 = vpop.f32.mrf.mxu1  ;;  %v1118_v55 = vadd.f32 %v1117_v54, %v1116_v53 }
  0xe8   :  { %v1153_v46 = vadd.f32 %v1152_v45, %v1151_v44 }
  0xe9   :  { %v205_v57 = vadd.f32 %v1118_v55, %v1066_v56 }
  0xeb   :  { %v414_v47 = vpop.f32.mrf.mxu1  ;;  %v275_v60 = vadd.f32 %v1153_v46, %v205_v57 }
  0xed   :  { %v1215_v48 = vpop.f32.mrf.mxu1 }
  0xf0   :  { %v510_v50 = vpop.f32.mrf.mxu1 }
  0xf1   :  { %v511_v51 = vadd.f32 %v1713_v49, %v510_v50 }
  0xf2   :  { %v1222_v52 = vpop.f32.mrf.mxu1 }
  0xf3   :  { %522 = vrot.lane.b32.xlu0 %v511_v51, %s1334_s1 }
 0x107   :  { %v1186_v58 = vpop.f32.mrf.mxu0 }
 0x109   :  { %v1187_v59 = vpop.f32.mrf.mxu0 }
 0x10a   :  { %v1188_v61 = vadd.f32 %v1187_v59, %v1186_v58 }
 0x10c   :  { %v345_v62 = vadd.f32 %v1188_v61, %v275_v60 }
 0x10e   :  { %v1720_v63 = vadd.f32 %v414_v47, %v345_v62 }
 0x110   :  { %v514_v0 = vadd.f32 %v511_v51, %v1720_v63 }
 0x112   :  { %v1070_v1 = vmul.f32 -1.442695, %v514_v0 }
 0x114   :  { %1264 = vpow2.f32 %v1070_v1 }
 0x121   :  { %v1265_v2 = vpop.eup %1264 }
 0x122   :  { %v518_v3 = vadd.f32 1.0, %v1265_v2 }
 0x124   :  { %1266 = vrcp.f32 %v518_v3 }
 0x131   :  { %v1267_v4 = vpop.eup %1266 }
 0x132   :  { %v532_v16 = vsub.f32 1.0, %v1267_v4 }
 0x165   :  { %v523_v5 = vpop.permute.xlu0 %522 }
 0x166   :  { %v525_v6 = vmul.f32 %v1267_v4, %v523_v5 }
 0x168   :  { %527 = vrot.lane.b32.xlu0 %v525_v6, %s1335_s24 }
 0x1da   :  { %v528_v7 = vpop.permute.xlu0 %527 }
 0x1db   :  { %v530_v9 = vadd.f32 %v528_v7, %v1720_v63 }
 0x1dd   :  { %1268 = vtanh.f32 %v530_v9 }
 0x1ea   :  { %v1269_v10 = vpop.eup %1268 }
 0x1eb   :  { %534 = vrot.lane.b32.xlu1 %v1269_v10, %s1336_s25 }
 0x1ef   :  { %538 = vrot.lane.b32.xlu1 %v1332_v8, %s1337_s26 }
 0x25d   :  { %v535_v13 = vpop.permute.xlu1 %534 }
 0x25e   :  { %v537_v19 = vmul.f32 %v535_v13, %v532_v16 }
 0x261   :  { %v539_v18 = vpop.permute.xlu1 %538 }
 0x262   :  { %v541_v20 = vmul.f32 %v1267_v4, %v539_v18 }
 0x264   :  { %v542_v21 = vadd.f32 %v541_v20, %v537_v19 }
 0x266   :  { %v544_v22 = vsel %vm543_vm3, %v542_v21, 0.0 }
 0x267   :  { %546 = vrot.lane.b32.xlu0 %v544_v22, %s1336_s25 }
 0x2d9   :  { %v547_v23 = vpop.permute.xlu0 %546 }
 0x2da   :  { %v549_v24 = vrot.slane %v547_v23, 7  ;;  %v22_v23 = vld [vmem:[%s1809_s2 + $0xc] sm:$0xff] }
 0x2dc   :  { %1228 = vmatmul.mubr.msk.f32.vlgmr.msra.gmra.mxu1 %vm436_vm4, %v549_v24 }
 0x2dd   :  { %1231 = vmatpush3.msk.msra.mxu1 %vm440_vm1, %v1601_v14  ;;  %1234 = vmatprep.mubr.msk.f32.mxu1 %vm1333_vm2, %v1332_v8 }
 0x2de   :  { %1232 = vmatprep.subr.mxu1 %v1332_v8 }
 0x2df   :  { %1233 = vmatpush3.msra.mxu1 %v1615_v17 }
 0x2e0   :  { %1237 = vmatprep.subr.mxu1 %v1332_v8 }
 0x39c   :  { %v619_v25 = vpop.f32.mrf.mxu1 }
 0x39d   :  { %v620_v26 = vadd.f32 %v1713_v49, %v619_v25 }
 0x39e   :  { %v1229_v27 = vpop.f32.mrf.mxu1 }
 0x39f   :  { %631 = vrot.lane.b32.xlu1 %v620_v26, %s1334_s1  ;;  %v623_v28 = vadd.f32 %v620_v26, %v1720_v63 }
 0x3a1   :  { %v1073_v29 = vmul.f32 -1.442695, %v623_v28 }
 0x3a3   :  { %1270 = vpow2.f32 %v1073_v29 }
 0x3b0   :  { %v1271_v30 = vpop.eup %1270 }
 0x3b1   :  { %v627_v31 = vadd.f32 1.0, %v1271_v30 }
 0x3b3   :  { %1272 = vrcp.f32 %v627_v31  ;;  %v957_v31 = vmul.u32 4, %v1729_v12 }
 0x3c0   :  { %v1273_v32 = vpop.eup %1272 }
 0x3c1   :  { %v641_v39 = vsub.f32 1.0, %v1273_v32 }
 0x411   :  { %v632_v33 = vpop.permute.xlu1 %631 }
 0x412   :  { %v634_v34 = vmul.f32 %v1273_v32, %v632_v33  ;;  %v958_v33 = vadd.s32 3, %v957_v31 }
 0x414   :  { %636 = vrot.lane.b32.xlu0 %v634_v34, %s1335_s24 }
 0x418   :  { %647 = vrot.lane.b32.xlu0 %v549_v24, %s1337_s26 }
 0x486   :  { %v637_v35 = vpop.permute.xlu0 %636 }
 0x487   :  { %v639_v36 = vadd.f32 %v637_v35, %v1720_v63 }
 0x489   :  { %1274 = vtanh.f32 %v639_v36 }
 0x48a   :  { %v648_v38 = vpop.permute.xlu0 %647 }
 0x48b   :  { %v650_v41 = vmul.f32 %v1273_v32, %v648_v38  ;;  %v956_v32 = vand.u32 127, %v418_v11 }
 0x48d   :  { %vm959_vm8 = vcmp.eq.s32.totalorder %v956_v32, %v958_v33 }
 0x48e   :  { %v960_v35 = vsel %vm959_vm8, 1.0, %v1332_v8 }
 0x496   :  { %v1275_v37 = vpop.eup %1274 }
 0x497   :  { %643 = vrot.lane.b32.xlu1 %v1275_v37, %s1336_s25 }
 0x509   :  { %v644_v40 = vpop.permute.xlu1 %643 }
 0x50a   :  { %v646_v42 = vmul.f32 %v644_v40, %v641_v39 }
 0x50c   :  { %v651_v43 = vadd.f32 %v650_v41, %v646_v42 }
 0x50e   :  { %v653_v44 = vsel %vm652_vm5, %v651_v43, %v544_v22  ;;  %v23_v22 = vld [vmem:[%s1809_s2 + $0x14] sm:$0x3] }
 0x50f   :  { %655 = vrot.lane.b32.xlu1 %v653_v44, %s1336_s25 }
 0x581   :  { %v656_v45 = vpop.permute.xlu1 %655 }
 0x582   :  { %v658_v46 = vrot.slane %v656_v45, 7 }
 0x584   :  { %1235 = vmatmul.mubr.msk.f32.vlgmr.msra.gmra.mxu1 %vm436_vm4, %v658_v46 }
 0x585   :  { %1238 = vmatpush3.msk.msra.mxu1 %vm440_vm1, %v1601_v14  ;;  %1241 = vmatprep.mubr.msk.f32.mxu1 %vm1333_vm2, %v1332_v8 }
 0x586   :  { %1239 = vmatprep.subr.mxu1 %v1332_v8 }
 0x587   :  { %1240 = vmatpush3.msra.mxu1 %v1615_v17 }
 0x588   :  { %1244 = vmatprep.subr.mxu1 %v1332_v8 }
 0x644   :  { %v728_v47 = vpop.f32.mrf.mxu1 }
 0x645   :  { %v729_v48 = vadd.f32 %v1713_v49, %v728_v47 }
 0x646   :  { %v1236_v50 = vpop.f32.mrf.mxu1 }
 0x647   :  { %740 = vrot.lane.b32.xlu0 %v729_v48, %s1334_s1  ;;  %v732_v51 = vadd.f32 %v729_v48, %v1720_v63 }
 0x649   :  { %v1076_v52 = vmul.f32 -1.442695, %v732_v51 }
 0x64b   :  { %1276 = vpow2.f32 %v1076_v52 }
 0x658   :  { %v1277_v14 = vpop.eup %1276 }
 0x659   :  { %v736_v53 = vadd.f32 1.0, %v1277_v14 }
 0x65b   :  { %1278 = vrcp.f32 %v736_v53 }
 0x668   :  { %v1279_v54 = vpop.eup %1278 }
 0x669   :  { %v750_v60 = vsub.f32 1.0, %v1279_v54 }
 0x6b9   :  { %v741_v55 = vpop.permute.xlu0 %740 }
 0x6ba   :  { %v743_v56 = vmul.f32 %v1279_v54, %v741_v55 }
 0x6bc   :  { %745 = vrot.lane.b32.xlu1 %v743_v56, %s1335_s24 }
 0x6c0   :  { %756 = vrot.lane.b32.xlu1 %v658_v46, %s1337_s26 }
 0x72e   :  { %v746_v17 = vpop.permute.xlu1 %745 }
 0x72f   :  { %v748_v57 = vadd.f32 %v746_v17, %v1720_v63 }
 0x731   :  { %1280 = vtanh.f32 %v748_v57 }
 0x732   :  { %v757_v59 = vpop.permute.xlu1 %756 }
 0x733   :  { %v759_v62 = vmul.f32 %v1279_v54, %v757_v59 }
 0x73e   :  { %v1281_v58 = vpop.eup %1280 }
 0x73f   :  { %752 = vrot.lane.b32.xlu0 %v1281_v58, %s1336_s25 }
 0x7b1   :  { %v753_v61 = vpop.permute.xlu0 %752 }
 0x7b2   :  { %v755_v0 = vmul.f32 %v753_v61, %v750_v60 }
 0x7b4   :  { %v760_v1 = vadd.f32 %v759_v62, %v755_v0 }
 0x7b6   :  { %v762_v2 = vsel %vm761_vm6, %v760_v1, %v653_v44 }
 0x7b7   :  { %764 = vrot.lane.b32.xlu0 %v762_v2, %s1336_s25 }
 0x829   :  { %v765_v3 = vpop.permute.xlu0 %764 }
 0x82a   :  { %v767_v4 = vrot.slane %v765_v3, 7 }
 0x82c   :  { %1242 = vmatmul.mubr.msk.f32.vlgmr.msra.gmra.mxu1 %vm436_vm4, %v767_v4 }
 0x82d   :  { %1248 = vmatprep.mubr.msk.f32.mxu1 %vm1333_vm2, %v1332_v8  ;;  %1245 = vmatpush3.msk.msra.mxu1 %vm440_vm1, %v23_v22 }
 0x82e   :  { %1246 = vmatprep.subr.mxu1 %v1332_v8 }
 0x82f   :  { %1247 = vmatpush3.msra.mxu1 %v22_v23 }
 0x830   :  { %1251 = vmatprep.subr.mxu1 %v1332_v8 }
 0x8ec   :  { %v837_v5 = vpop.f32.mrf.mxu1 }
 0x8ed   :  { %v838_v6 = vadd.f32 %v1713_v49, %v837_v5 }
 0x8ee   :  { %v1243_v7 = vpop.f32.mrf.mxu1 }
 0x8ef   :  { %849 = vrot.lane.b32.xlu1 %v838_v6, %s1334_s1  ;;  %v841_v9 = vadd.f32 %v838_v6, %v1720_v63 }
 0x8f1   :  { %v1079_v10 = vmul.f32 -1.442695, %v841_v9 }
 0x8f3   :  { %1282 = vpow2.f32 %v1079_v10 }
 0x900   :  { %v1283_v13 = vpop.eup %1282 }
 0x901   :  { %v845_v16 = vadd.f32 1.0, %v1283_v13 }
 0x903   :  { %1284 = vrcp.f32 %v845_v16 }
 0x910   :  { %v1285_v18 = vpop.eup %1284 }
 0x911   :  { %v859_v25 = vsub.f32 1.0, %v1285_v18 }
 0x961   :  { %v850_v19 = vpop.permute.xlu1 %849 }
 0x962   :  { %v852_v20 = vmul.f32 %v1285_v18, %v850_v19 }
 0x964   :  { %854 = vrot.lane.b32.xlu0 %v852_v20, %s1335_s24 }
 0x968   :  { %865 = vrot.lane.b32.xlu0 %v767_v4, %s1337_s26 }
 0x9d6   :  { %v855_v21 = vpop.permute.xlu0 %854 }
 0x9d7   :  { %v857_v49 = vadd.f32 %v855_v21, %v1720_v63 }
 0x9d9   :  { %1286 = vtanh.f32 %v857_v49 }
 0x9da   :  { %v866_v63 = vpop.permute.xlu0 %865 }
 0x9db   :  { %v868_v27 = vmul.f32 %v1285_v18, %v866_v63 }
 0x9e6   :  { %v1287_v24 = vpop.eup %1286 }
 0x9e7   :  { %861 = vrot.lane.b32.xlu1 %v1287_v24, %s1336_s25 }
 0xa59   :  { %v862_v26 = vpop.permute.xlu1 %861 }
 0xa5a   :  { %v864_v28 = vmul.f32 %v862_v26, %v859_v25 }
 0xa5c   :  { %v869_v29 = vadd.f32 %v868_v27, %v864_v28 }
 0xa5e   :  { %v871_v30 = vsel %vm870_vm7, %v869_v29, %v762_v2 }
 0xa5f   :  { %877 = vrot.lane.b32.xlu1 %v871_v30, %s1336_s25 }
 0xad1   :  { %v878_v34 = vpop.permute.xlu1 %877 }
 0xad2   :  { %1249 = vmatmul.mubr.msk.f32.vlgmr.msra.gmra.mxu1 %vm436_vm4, %v878_v34 }
 0xad3   :  { %1252 = vmatpush3.msra.mxu1 %v878_v34  ;;  %1253 = vmatprep.mubr.msk.f32.mxu1 %vm1333_vm2, %v1332_v8 }
 0xad6   :  { %1254 = vmatmul.mubr.msk.f32.vlgmr.msra.gmra.mxu1 %vm962_vm9, %v960_v35 }
 0xb92   :  { %v950_v11 = vpop.f32.mrf.mxu1 }
 0xb93   :  { %v951_v12 = vadd.f32 %v1080_v15, %v950_v11 }
 0xb94   :  { %v1250_v36 = vpop.f32.mrf.mxu1 }
 0xb95   :  { %954 = vst.msk [vmem:[#allocation2] sm:$0xff] %vm436_vm4, %v951_v12 }
 0xb96   :  { %v1032_v37 = vpop.f32.mrf.mxu1 }
 0xb97   :  { %1299 = shalt.err (!%p1296_p4)
}
 0xb98   :  { %1047 = dma.vmem_to_hbm [thread:$0]  %s1045_s8, 128, %s1810_s3, [#allocation3]   ;;  %1037 = vst.msk [vmem:[#allocation4] sm:$0x3] %vm1036_vm10, %v1032_v37  ;;  %v1255_v8 = vpop.f32.mrf.mxu1 }
 0xb99   :  { %s1308_s13 = scalar_lea.vmem %s1055_s10, 32  ;;  %p1313_p6 = scmp.lt.s32.totalorder %s1055_s10, %s1055_s10 }
 0xb9a   :  { %p1309_p5 = scmp.ne.s32.totalorder %s1055_s10, %s1308_s13  ;;  %p1314_p7 = scmp.lt.s32.totalorder %s1308_s13, %s1308_s13 }
 0xb9c   :  { %p1315_p8 = por %p1314_p7, %p1313_p6 }
 0xb9e   :  { %p1316_p9 = pnand %p1315_p8, %p1309_p5 }
 0xba0   :  { %1319 = shalt.err (!%p1316_p9)
}
 0xba1   :  { %1057 = dma.vmem_to_hbm [thread:$0]  %s1055_s10, 32, %s1811_s4, [#allocation5]  }
 0xba2   :  { %1328 = dma.done.wait [#allocation3], 128  }
 0xba3   :  { %1329 = vsyncadd [#allocation3], 4294967168 }
 0xba4   :  { %1330 = dma.done.wait [#allocation5], 32  }
 0xba5   :  { %1331 = vsyncadd [#allocation5], 4294967264 }
 0xba6   :  { %1064 = vsyncpa [#allocation3], 1 }
 0xba7   :  { %1065 = vsyncpa [#allocation5], 1 }

</bundles_post_ra>
